<compile_context>
chip_gen: v6e
topology: v6e:2x2x1
jax: 0.10.0
libtpu: 0.0.40
codegen_flags: <defaults>
</compile_context>

<pallas_src>
import math
import functools

import jax
import jax.numpy as jnp
from jax import lax
from jax.experimental import pallas as pl
from jax.experimental.pallas import tpu as pltpu


# ----------------------------- elementwise math -----------------------------

_INV_3P75 = 1.0 / 3.75


def _i0e(x):
    ax = jnp.abs(x)
    small = ax < 3.75
    t = ax * _INV_3P75
    t = t * t
    p_small = 1.0 + t * (3.5156229 + t * (3.0899424 + t * (1.2067492
              + t * (0.2659732 + t * (0.0360768 + t * 0.0045813)))))
    small_val = p_small * jnp.exp(-ax)
    axc = jnp.maximum(ax, 3.75)
    r = lax.rsqrt(axc)               # single EUP op
    ts = 3.75 * (r * r)              # == 3.75 / axc, no extra reciprocal / approx error
    p_large = (0.39894228 + ts * (0.01328592 + ts * (0.00225319
              + ts * (-0.00157565 + ts * (0.00916281 + ts * (-0.02057706
              + ts * (0.02635537 + ts * (-0.01647633 + ts * 0.00392377))))))))
    large_val = p_large * r
    return jnp.where(small, small_val, large_val)


def _i1e(x):
    ax = jnp.abs(x)
    small = ax < 3.75
    t = ax * _INV_3P75
    t = t * t
    p_small = ax * (0.5 + t * (0.87890594 + t * (0.51498869 + t * (0.15084934
              + t * (0.02658733 + t * (0.00301532 + t * 0.00032411))))))
    small_val = p_small * jnp.exp(-ax)
    axc = jnp.maximum(ax, 3.75)
    r = lax.rsqrt(axc)
    ts = 3.75 * (r * r)
    p_large = (0.39894228 + ts * (-0.03988024 + ts * (-0.00362018
              + ts * (0.00163801 + ts * (-0.01031555 + ts * (0.02282967
              + ts * (-0.02895312 + ts * (0.01787654 + ts * (-0.00420059)))))))))
    large_val = p_large * r
    return jnp.where(small, small_val, large_val) * jnp.sign(x)


def _make_general_ive(v, num_terms=16):
    # ive(v, z) = exp(-z) * (z/2)^v * sum_k (z^2/4)^k / (k! Gamma(v+k+1))
    # Coefficients depend only on (static) v and k -> baked in host-side.
    # 16 terms is f32-converged for the moderate-|z| regime (|z| <~ 12) used by
    # multiflow's SO(3) code; this is the VALU-bound branch, so the term count
    # was trimmed from 24 per the perf review.
    coeffs = tuple(1.0 / (math.factorial(k) * math.gamma(v + k + 1))
                   for k in range(num_terms))
    even = coeffs[0::2]
    odd = coeffs[1::2]

    def f(z):
        # TODO(synk): general (non 0/1) order uses the power series only; large-|z|
        # uniform asymptotic expansion and negative-z / negative-v handling are not
        # implemented (same caveat as the original).
        az = jnp.abs(z)
        q = az * az * 0.25
        q2 = q * q
        # Even/odd split halves the dependent-FMA chain length vs one Horner sweep.
        s_e = jnp.full_like(az, even[-1])
        for c in even[-2::-1]:
            s_e = s_e * q2 + c
        s_o = jnp.full_like(az, odd[-1])
        for c in odd[-2::-1]:
            s_o = s_o * q2 + c
        s = s_e + q * s_o
        prefac = jnp.exp(v * jnp.log(az * 0.5) - az)   # (z/2)^v * exp(-z)
        return prefac * s

    return f


def _select_body(v):
    if math.isclose(v, 0.0, abs_tol=1e-8):
        return _i0e
    elif math.isclose(v, 1.0, abs_tol=1e-8):
        return _i1e
    else:
        return _make_general_ive(v)


# --------------------------------- kernel -----------------------------------

def _ive_kernel(z_ref, o_ref, *, body):
    z = z_ref[...].astype(jnp.float32)
    o_ref[...] = body(z).astype(o_ref.dtype)


# Layout selection (all static / host-side).
_LANE_CHOICES = (8192, 4096, 2048, 1024, 512, 256, 128)
_TARGET_BLOCK_BYTES = 4 << 20     # ~4 MiB per input block (dtype-scaled via elem_bytes)
_MULTI_STEP_BYTES = 1 << 20       # arrays above this get >= ~4 grid steps (dual-TC)


def _choose_layout(n_pad, elem_bytes):
    """n_pad is a multiple of 128. Returns (W, rows, BR)."""
    # Widest lane-dense last dim that divides n_pad (no reshape copy needed).
    W = 128
    for w in _LANE_CHOICES:
        if n_pad % w == 0:
            W = w
            break
    rows = n_pad // W
    row_bytes = W * elem_bytes
    BR = max(8, (_TARGET_BLOCK_BYTES // row_bytes) // 8 * 8)
    if rows * row_bytes > _MULTI_STEP_BYTES:
        # cap block so there are >= ~4 grid steps (megacore sharding + pipelining)
        BR = min(BR, max(8, (rows // 4) // 8 * 8))
    if BR >= rows:
        BR = rows                  # single full-rows block (any row count is legal)
    return W, rows, BR


@functools.partial(jax.jit, static_argnums=0)
def ive_pallas(v, z):
    """Pallas equivalent of Ive(v)(z). v is static, z any shape / float dtype."""
    body = _select_body(float(v))
    orig_shape, dtype = z.shape, z.dtype
    elem_bytes = jnp.dtype(dtype).itemsize

    flat = z.reshape(-1)
    n = flat.size
    n_pad = -(-n // 128) * 128
    pad = n_pad - n
    if pad:
        # TODO(synk): only a truly ragged tail (n % 128 != 0) pays this pad/slice copy.
        flat = jnp.pad(flat, (0, pad), constant_values=1.0)

    W, rows, BR = _choose_layout(n_pad, elem_bytes)
    x2d = flat.reshape(rows, W)

    grid = (pl.cdiv(rows, BR),)     # Pallas masks the partial final block
    cost = pl.CostEstimate(
        flops=40 * n_pad,
        transcendentals=2 * n_pad,
        bytes_accessed=2 * n_pad * elem_bytes,
    )
    out2d = pl.pallas_call(
        functools.partial(_ive_kernel, body=body),
        out_shape=jax.ShapeDtypeStruct((rows, W), dtype),
        grid=grid,
        in_specs=[pl.BlockSpec((BR, W), lambda i: (i, 0))],
        out_specs=pl.BlockSpec((BR, W), lambda i: (i, 0)),
        compiler_params=pltpu.CompilerParams(
            dimension_semantics=("parallel",),
            vmem_limit_bytes=48 << 20),
        cost_estimate=cost,
    )(x2d)

    out_flat = out2d.reshape(-1)
    if pad:
        out_flat = out_flat[:n]
    return out_flat.reshape(orig_shape)


class IvePallas:
    """Mirror of torch `Ive(v)` module (forward only)."""

    def __init__(self, v):
        self.v = float(v)

    def __call__(self, z):
        return ive_pallas(self.v, z)


# ----------------------------------- main ------------------------------------

if __name__ == "__main__":
    key = jax.random.PRNGKey(0)
    # small NCHW-like input, values spanning both polynomial branches
    z = jax.random.uniform(key, (2, 4, 16, 16), dtype=jnp.float32,
                           minval=0.05, maxval=10.0)

    # v = 0 branch (i0e)
    y0 = jax.block_until_ready(IvePallas(0.0)(z))
    ref0 = jax.scipy.special.i0e(z)
    assert jnp.max(jnp.abs(y0 - ref0)) < 1e-5, "i0e mismatch"

    # v = 1 branch (i1e)
    y1 = jax.block_until_ready(IvePallas(1.0)(z))
    ref1 = jax.scipy.special.i1e(z)
    assert jnp.max(jnp.abs(y1 - ref1)) < 1e-5, "i1e mismatch"

    # general-order branch (series), e.g. v = 1.5
    y_half = jax.block_until_ready(IvePallas(1.5)(z))
    assert bool(jnp.all(jnp.isfinite(y_half)))

    # ragged-size sanity check (exercises the minimal pad path)
    z_odd = jax.random.uniform(jax.random.PRNGKey(1), (3, 7, 11),
                               dtype=jnp.float32, minval=0.1, maxval=5.0)
    y_odd = jax.block_until_ready(IvePallas(0.0)(z_odd))
    assert jnp.max(jnp.abs(y_odd - jax.scipy.special.i0e(z_odd))) < 1e-5

    print("KERNEL_OK")
</pallas_src>

<mosaic_0001>
module attributes {stable_mosaic.version = 11 : i64} {
  func.func @_ive_kernel(%arg0: i32, %arg1: memref<1x2048xf32, #tpu.memory_space<vmem>>, %arg2: memref<1x2048xf32, #tpu.memory_space<vmem>>) attributes {dimension_semantics = [#tpu.dimension_semantics<parallel>], iteration_bounds = array<i64: 1>, scalar_prefetch = 0 : i64, scratch_operands = 0 : i64, tpu.core_type = #tpu.core_type<tc>, window_params = [{transform_indices = @transform_0, window_bounds = array<i64: 1, 2048>}, {transform_indices = @transform_1, window_bounds = array<i64: 1, 2048>}]} {
    %c0 = arith.constant 0 : index
    %c0_0 = arith.constant 0 : index
    %0 = vector.load %arg1[%c0, %c0_0] : memref<1x2048xf32, #tpu.memory_space<vmem>>, vector<1x2048xf32>
    %1 = math.absf %0 : vector<1x2048xf32>
    %cst = arith.constant 3.750000e+00 : f32
    %2 = vector.broadcast %cst : f32 to vector<1x2048xf32>
    %3 = arith.cmpf olt, %1, %2 : vector<1x2048xf32>
    %cst_1 = arith.constant 0.266666681 : f32
    %4 = vector.broadcast %cst_1 : f32 to vector<1x2048xf32>
    %5 = arith.mulf %1, %4 : vector<1x2048xf32>
    %6 = arith.mulf %5, %5 : vector<1x2048xf32>
    %cst_2 = arith.constant 4.581300e-03 : f32
    %7 = vector.broadcast %cst_2 : f32 to vector<1x2048xf32>
    %8 = arith.mulf %6, %7 : vector<1x2048xf32>
    %cst_3 = arith.constant 3.607680e-02 : f32
    %9 = vector.broadcast %cst_3 : f32 to vector<1x2048xf32>
    %10 = arith.addf %9, %8 : vector<1x2048xf32>
    %11 = arith.mulf %6, %10 : vector<1x2048xf32>
    %cst_4 = arith.constant 0.26597321 : f32
    %12 = vector.broadcast %cst_4 : f32 to vector<1x2048xf32>
    %13 = arith.addf %12, %11 : vector<1x2048xf32>
    %14 = arith.mulf %6, %13 : vector<1x2048xf32>
    %cst_5 = arith.constant 1.2067492 : f32
    %15 = vector.broadcast %cst_5 : f32 to vector<1x2048xf32>
    %16 = arith.addf %15, %14 : vector<1x2048xf32>
    %17 = arith.mulf %6, %16 : vector<1x2048xf32>
    %cst_6 = arith.constant 3.08994246 : f32
    %18 = vector.broadcast %cst_6 : f32 to vector<1x2048xf32>
    %19 = arith.addf %18, %17 : vector<1x2048xf32>
    %20 = arith.mulf %6, %19 : vector<1x2048xf32>
    %cst_7 = arith.constant 3.51562285 : f32
    %21 = vector.broadcast %cst_7 : f32 to vector<1x2048xf32>
    %22 = arith.addf %21, %20 : vector<1x2048xf32>
    %23 = arith.mulf %6, %22 : vector<1x2048xf32>
    %cst_8 = arith.constant 1.000000e+00 : f32
    %24 = vector.broadcast %cst_8 : f32 to vector<1x2048xf32>
    %25 = arith.addf %24, %23 : vector<1x2048xf32>
    %cst_9 = arith.constant 0.000000e+00 : f32
    %26 = vector.broadcast %cst_9 : f32 to vector<1x2048xf32>
    %27 = arith.subf %26, %1 : vector<1x2048xf32>
    %28 = math.exp %27 : vector<1x2048xf32>
    %29 = arith.mulf %25, %28 : vector<1x2048xf32>
    %cst_10 = arith.constant 3.750000e+00 : f32
    %30 = vector.broadcast %cst_10 : f32 to vector<1x2048xf32>
    %31 = arith.maximumf %1, %30 : vector<1x2048xf32>
    %32 = math.rsqrt %31 : vector<1x2048xf32>
    %33 = arith.mulf %32, %32 : vector<1x2048xf32>
    %cst_11 = arith.constant 3.750000e+00 : f32
    %34 = vector.broadcast %cst_11 : f32 to vector<1x2048xf32>
    %35 = arith.mulf %34, %33 : vector<1x2048xf32>
    %cst_12 = arith.constant 3.923770e-03 : f32
    %36 = vector.broadcast %cst_12 : f32 to vector<1x2048xf32>
    %37 = arith.mulf %35, %36 : vector<1x2048xf32>
    %cst_13 = arith.constant -0.0164763294 : f32
    %38 = vector.broadcast %cst_13 : f32 to vector<1x2048xf32>
    %39 = arith.addf %38, %37 : vector<1x2048xf32>
    %40 = arith.mulf %35, %39 : vector<1x2048xf32>
    %cst_14 = arith.constant 0.0263553709 : f32
    %41 = vector.broadcast %cst_14 : f32 to vector<1x2048xf32>
    %42 = arith.addf %41, %40 : vector<1x2048xf32>
    %43 = arith.mulf %35, %42 : vector<1x2048xf32>
    %cst_15 = arith.constant -0.0205770601 : f32
    %44 = vector.broadcast %cst_15 : f32 to vector<1x2048xf32>
    %45 = arith.addf %44, %43 : vector<1x2048xf32>
    %46 = arith.mulf %35, %45 : vector<1x2048xf32>
    %cst_16 = arith.constant 0.00916280969 : f32
    %47 = vector.broadcast %cst_16 : f32 to vector<1x2048xf32>
    %48 = arith.addf %47, %46 : vector<1x2048xf32>
    %49 = arith.mulf %35, %48 : vector<1x2048xf32>
    %cst_17 = arith.constant -1.575650e-03 : f32
    %50 = vector.broadcast %cst_17 : f32 to vector<1x2048xf32>
    %51 = arith.addf %50, %49 : vector<1x2048xf32>
    %52 = arith.mulf %35, %51 : vector<1x2048xf32>
    %cst_18 = arith.constant 2.253190e-03 : f32
    %53 = vector.broadcast %cst_18 : f32 to vector<1x2048xf32>
    %54 = arith.addf %53, %52 : vector<1x2048xf32>
    %55 = arith.mulf %35, %54 : vector<1x2048xf32>
    %cst_19 = arith.constant 0.01328592 : f32
    %56 = vector.broadcast %cst_19 : f32 to vector<1x2048xf32>
    %57 = arith.addf %56, %55 : vector<1x2048xf32>
    %58 = arith.mulf %35, %57 : vector<1x2048xf32>
    %cst_20 = arith.constant 0.398942292 : f32
    %59 = vector.broadcast %cst_20 : f32 to vector<1x2048xf32>
    %60 = arith.addf %59, %58 : vector<1x2048xf32>
    %61 = arith.mulf %60, %32 : vector<1x2048xf32>
    %62 = arith.select %3, %29, %61 : vector<1x2048xi1>, vector<1x2048xf32>
    %c0_21 = arith.constant 0 : index
    %c0_22 = arith.constant 0 : index
    %63 = vector.load %arg2[%c0_21, %c0_22] : memref<1x2048xf32, #tpu.memory_space<vmem>>, vector<1x2048xf32>
    tpu.vector_store %arg2[%c0_21, %c0_22], %62 {strides = array<i32>} : memref<1x2048xf32, #tpu.memory_space<vmem>>, vector<1x2048xf32>,
    return
  }
  func.func @transform_0(%arg0: i32) -> (i32, i32) {
    %c0_i32 = arith.constant 0 : i32
    %c0_i32_0 = arith.constant 0 : i32
    return %arg0, %c0_i32 : i32, i32
  }
  func.func @transform_1(%arg0: i32) -> (i32, i32) {
    %c0_i32 = arith.constant 0 : i32
    %c0_i32_0 = arith.constant 0 : i32
    return %arg0, %c0_i32 : i32, i32
  }
}

</mosaic_0001>

<bundles_post_ra>
// kernel: ive_pallas.1
= control target key start
LH: loop header
LB: loop body
LE: loop exit
PB: predicated region body
PF: predicated region fallthrough
CT: control target
= control target key end

     0   :  { %s152_s0 = inlined_call_operand.vmem [shape: f32[1,2048], index: 0, kind: input, shape index: {}]   ;;  %s153_s1 = inlined_call_operand.vmem [shape: f32[1,2048], index: 1, kind: output, shape index: {}]  }
   0x1   :  { %v8_v0 = vld [vmem:[%s152_s0] sm:$0xff]  ;;  %v9_v1 = vld [vmem:[%s152_s0 + $0x8] sm:$0xff] }
   0x2   :  { %v124_v2 = vand.u32 2147483647, %v8_v0  ;;  %v126_v3 = vand.u32 2147483647, %v9_v1 }
   0x4   :  { %v14_v4 = vmul.f32 0.26666668, %v124_v2  ;;  %v50_v5 = vmax.f32 %v124_v2, 3.75  ;;  %v15_v6 = vmul.f32 0.26666668, %v126_v3  ;;  %v51_v7 = vmax.f32 %v126_v3, 3.75 }
   0x5   :  { %v42_v35 = vsub.f32 0.0, %v124_v2  ;;  %v43_v38 = vsub.f32 0.0, %v126_v3  ;;  %vm12_vm0 = vcmp.lt.f32.partialorder %v124_v2, 3.75  ;;  %vm13_vm1 = vcmp.lt.f32.partialorder %v126_v3, 3.75 }
   0x6   :  { %v16_v8 = vmul.f32 %v14_v4, %v14_v4  ;;  %100 = vrsqrt.f32 %v50_v5  ;;  %v17_v9 = vmul.f32 %v15_v6, %v15_v6 }
   0x7   :  { %102 = vrsqrt.f32 %v51_v7  ;;  %v44_v43 = vmul.f32 1.442695, %v42_v35  ;;  %v46_v46 = vmul.f32 1.442695, %v43_v38 }
   0x8   :  { %v18_v10 = vmul.f32 0.0045813, %v16_v8  ;;  %v19_v11 = vmul.f32 0.0045813, %v17_v9 }
   0x9   :  { %104 = vpow2.f32 %v44_v43 }
   0xa   :  { %v20_v12 = vadd.f32 0.0360768, %v18_v10  ;;  %v21_v13 = vadd.f32 0.0360768, %v19_v11  ;;  %106 = vpow2.f32 %v46_v46 }
   0xc   :  { %v22_v14 = vmul.f32 %v20_v12, %v16_v8  ;;  %v23_v15 = vmul.f32 %v21_v13, %v17_v9 }
   0xe   :  { %v24_v16 = vadd.f32 0.2659732, %v22_v14  ;;  %v25_v18 = vadd.f32 0.2659732, %v23_v15 }
  0x10   :  { %v26_v22 = vmul.f32 %v24_v16, %v16_v8  ;;  %v27_v24 = vmul.f32 %v25_v18, %v17_v9 }
  0x12   :  { %v28_v28 = vadd.f32 1.2067492, %v26_v22  ;;  %v29_v30 = vadd.f32 1.2067492, %v27_v24 }
  0x13   :  { %v132_v17 = vpop.eup %100 }
  0x14   :  { %v134_v19 = vpop.eup %102  ;;  %v54_v20 = vmul.f32 %v132_v17, %v132_v17  ;;  %v30_v34 = vmul.f32 %v28_v28, %v16_v8  ;;  %v31_v37 = vmul.f32 %v29_v30, %v17_v9 }
  0x15   :  { %v55_v21 = vmul.f32 %v134_v19, %v134_v19 }
  0x16   :  { %v56_v23 = vmul.f32 3.75, %v54_v20  ;;  %v32_v42 = vadd.f32 3.0899425, %v30_v34  ;;  %v33_v45 = vadd.f32 3.0899425, %v31_v37  ;;  %v105_v10 = vpop.eup %104 }
  0x17   :  { %v57_v25 = vmul.f32 3.75, %v55_v21  ;;  %v107_v13 = vpop.eup %106 }
  0x18   :  { %v58_v26 = vmul.f32 0.00392377, %v56_v23  ;;  %v34_v50 = vmul.f32 %v32_v42, %v16_v8  ;;  %v35_v52 = vmul.f32 %v33_v45, %v17_v9 }
  0x19   :  { %v59_v27 = vmul.f32 0.00392377, %v57_v25 }
  0x1a   :  { %v60_v29 = vadd.f32 -0.01647633, %v58_v26  ;;  %v36_v56 = vadd.f32 3.5156229, %v34_v50  ;;  %v37_v58 = vadd.f32 3.5156229, %v35_v52 }
  0x1b   :  { %v61_v31 = vadd.f32 -0.01647633, %v59_v27 }
  0x1c   :  { %v62_v32 = vmul.f32 %v60_v29, %v56_v23  ;;  %v38_v62 = vmul.f32 %v36_v56, %v16_v8  ;;  %v39_v0 = vmul.f32 %v37_v58, %v17_v9 }
  0x1d   :  { %v63_v33 = vmul.f32 %v61_v31, %v57_v25 }
  0x1e   :  { %v64_v36 = vadd.f32 0.02635537, %v62_v32  ;;  %v40_v6 = vadd.f32 1.0, %v38_v62  ;;  %v41_v11 = vadd.f32 1.0, %v39_v0 }
  0x1f   :  { %v65_v39 = vadd.f32 0.02635537, %v63_v33 }
  0x20   :  { %v66_v40 = vmul.f32 %v64_v36, %v56_v23  ;;  %v48_v16 = vmul.f32 %v105_v10, %v40_v6  ;;  %v49_v20 = vmul.f32 %v107_v13, %v41_v11 }
  0x21   :  { %v67_v41 = vmul.f32 %v65_v39, %v57_v25 }
  0x22   :  { %v68_v44 = vadd.f32 -0.02057706, %v66_v40 }
  0x23   :  { %v69_v47 = vadd.f32 -0.02057706, %v67_v41 }
  0x24   :  { %v70_v48 = vmul.f32 %v68_v44, %v56_v23 }
  0x25   :  { %v71_v49 = vmul.f32 %v69_v47, %v57_v25 }
  0x26   :  { %v72_v51 = vadd.f32 0.00916281, %v70_v48 }
  0x27   :  { %v73_v53 = vadd.f32 0.00916281, %v71_v49 }
  0x28   :  { %v74_v54 = vmul.f32 %v72_v51, %v56_v23 }
  0x29   :  { %v75_v55 = vmul.f32 %v73_v53, %v57_v25 }
  0x2a   :  { %v76_v57 = vadd.f32 -0.00157565, %v74_v54 }
  0x2b   :  { %v77_v59 = vadd.f32 -0.00157565, %v75_v55 }
  0x2c   :  { %v78_v60 = vmul.f32 %v76_v57, %v56_v23 }
  0x2d   :  { %v79_v61 = vmul.f32 %v77_v59, %v57_v25 }
  0x2e   :  { %v80_v63 = vadd.f32 0.00225319, %v78_v60 }
  0x2f   :  { %v81_v1 = vadd.f32 0.00225319, %v79_v61 }
  0x30   :  { %v82_v4 = vmul.f32 %v80_v63, %v56_v23 }
  0x31   :  { %v83_v5 = vmul.f32 %v81_v1, %v57_v25 }
  0x32   :  { %v84_v7 = vadd.f32 0.01328592, %v82_v4 }
  0x33   :  { %v85_v12 = vadd.f32 0.01328592, %v83_v5 }
  0x34   :  { %v86_v14 = vmul.f32 %v84_v7, %v56_v23 }
  0x35   :  { %v87_v15 = vmul.f32 %v85_v12, %v57_v25 }
  0x36   :  { %v88_v18 = vadd.f32 0.3989423, %v86_v14 }
  0x37   :  { %v89_v21 = vadd.f32 0.3989423, %v87_v15 }
  0x38   :  { %v90_v8 = vmul.f32 %v132_v17, %v88_v18 }
  0x39   :  { %v91_v9 = vmul.f32 %v134_v19, %v89_v21 }
  0x3a   :  { %v92_v22 = vsel %vm12_vm0, %v48_v16, %v90_v8 }
  0x3b   :  { %94 = vst [vmem:[%s153_s1] sm:$0xff] %v92_v22  ;;  %v93_v24 = vsel %vm13_vm1, %v49_v20, %v91_v9 }
  0x3c   :  { %95 = vst [vmem:[%s153_s1 + $0x8] sm:$0xff] %v93_v24 }

</bundles_post_ra>
